<compile_context>
chip_gen: v5e
topology: v5e:2x2
jax: 0.10.0
libtpu: 0.0.40
codegen_flags: <defaults>
</compile_context>

<pallas_src>
import functools

import jax
import jax.numpy as jnp
from jax.experimental import pallas as pl
from jax.experimental.pallas import tpu as pltpu


def _encoder_gru_kernel(tokens_ref,   # SMEM (T,) int32   scalar-prefetch token ids
                        emb_ref,      # VMEM (V, H)       embedding table (resident)
                        h0_ref,       # VMEM (1, H)       initial hidden
                        wih_ref,      # VMEM (3, H, H)    W_ih^T, gate-major [r|z|n]
                        whh_ref,      # VMEM (3, H, H)    W_hh^T, gate-major [r|z|n]
                        bih_ref,      # VMEM (3, 1, H)
                        bhh_ref,      # VMEM (3, 1, H)
                        out_ref,      # VMEM (1, 1, H)    per-timestep output block
                        h_scratch,    # VMEM (1, H) f32   hidden carried across steps
                        *, n_layers):
    t = pl.program_id(0)

    @pl.when(t == 0)
    def _():
        h_scratch[...] = h0_ref[...].astype(jnp.float32)

    tok = tokens_ref[t]
    # Fused embedding lookup: dynamic one-row slice of the VMEM-resident table.
    x = emb_ref[pl.ds(tok, 1), :].astype(jnp.float32)     # (1, H)
    h = h_scratch[...]                                    # (1, H) f32

    def gates(v, w_ref, b_ref):
        # Three lane-aligned (1,H)x(H,H) MXU matmuls (gate order r, z, n);
        # avoids slicing a fused (1,3H) result inside a 128-lane vreg.
        return [jnp.dot(v, w_ref[g], preferred_element_type=jnp.float32) + b_ref[g]
                for g in range(3)]

    for _ in range(n_layers):          # static tiny loop; same weights re-applied
        gi_r, gi_z, gi_n = gates(x, wih_ref, bih_ref)
        gh_r, gh_z, gh_n = gates(h, whh_ref, bhh_ref)
        r = jax.nn.sigmoid(gi_r + gh_r)
        z = jax.nn.sigmoid(gi_z + gh_z)
        n = jnp.tanh(gi_n + r * gh_n)
        h = (1.0 - z) * n + z * h
        x = h

    h_scratch[...] = h
    out_ref[0] = h.astype(out_ref.dtype)


def init_encoder_params(key, input_size, hidden_size):
    """PyTorch-layout params: Embedding ~ N(0,1); GRU ~ U(-1/sqrt(H), 1/sqrt(H))."""
    ks = jax.random.split(key, 5)
    k = 1.0 / jnp.sqrt(hidden_size)
    return {
        "embedding": jax.random.normal(ks[0], (input_size, hidden_size), jnp.float32),
        "w_ih": jax.random.uniform(ks[1], (3 * hidden_size, hidden_size),
                                   jnp.float32, -k, k),
        "w_hh": jax.random.uniform(ks[2], (3 * hidden_size, hidden_size),
                                   jnp.float32, -k, k),
        "b_ih": jax.random.uniform(ks[3], (3 * hidden_size,), jnp.float32, -k, k),
        "b_hh": jax.random.uniform(ks[4], (3 * hidden_size,), jnp.float32, -k, k),
    }


def pack_encoder_params(raw):
    """ONE-TIME repack into the kernel layout (pre-transposed, gate-major).
    Done at init, never per forward call."""
    H = raw["embedding"].shape[1]

    def gate_major_t(w):                 # (3H, H) -> (3, H, H) with [g] = W_g^T
        return jnp.transpose(w.reshape(3, H, H), (0, 2, 1))

    return {
        "embedding": raw["embedding"],
        "w_ih_t": gate_major_t(raw["w_ih"]),
        "w_hh_t": gate_major_t(raw["w_hh"]),
        "b_ih": raw["b_ih"].reshape(3, 1, H),
        "b_hh": raw["b_hh"].reshape(3, 1, H),
    }


def encoder_rnn_forward_seq(tokens, hidden, params, *, n_layers=1):
    """Run the EncoderRNN forward over a whole token sequence in ONE pallas_call.

    tokens: (T,) int32 token ids
    hidden: (1, 1, H) float32 initial hidden
    returns: (outputs (T, H) float32, final hidden (1, 1, H) float32)
             outputs[t] is the flattened PyTorch `output` of step t.
    """
    emb = params["embedding"]
    V, H = emb.shape
    T = tokens.shape[0]
    tokens = tokens.astype(jnp.int32)
    h0 = hidden.reshape(1, H).astype(jnp.float32)

    grid_spec = pltpu.PrefetchScalarGridSpec(
        num_scalar_prefetch=1,          # tokens -> SMEM, visible to index_maps + kernel
        grid=(T,),
        in_specs=[
            # Constant block indices -> each operand DMA'd once, resident in
            # VMEM across all timesteps (no per-step weight re-fetch).
            # TODO(synk): for large vocabularies switch the embedding spec to a
            # pl.Element row-gather BlockSpec instead of a full VMEM copy, and
            # tile the (3,H,H) weights over a column grid for v7x's 64 MiB VMEM.
            pl.BlockSpec((V, H), lambda t, toks: (0, 0)),          # embedding
            pl.BlockSpec((1, H), lambda t, toks: (0, 0)),          # h0
            pl.BlockSpec((3, H, H), lambda t, toks: (0, 0, 0)),    # W_ih^T
            pl.BlockSpec((3, H, H), lambda t, toks: (0, 0, 0)),    # W_hh^T
            pl.BlockSpec((3, 1, H), lambda t, toks: (0, 0, 0)),    # b_ih
            pl.BlockSpec((3, 1, H), lambda t, toks: (0, 0, 0)),    # b_hh
        ],
        out_specs=pl.BlockSpec((1, 1, H), lambda t, toks: (t, 0, 0)),
        scratch_shapes=[pltpu.VMEM((1, H), jnp.float32)],          # carried hidden
    )

    outputs = pl.pallas_call(
        functools.partial(_encoder_gru_kernel, n_layers=n_layers),
        grid_spec=grid_spec,
        out_shape=jax.ShapeDtypeStruct((T, 1, H), jnp.float32),
        compiler_params=pltpu.CompilerParams(
            dimension_semantics=("arbitrary",)),   # time axis carries state
    )(tokens, emb, h0,
      params["w_ih_t"], params["w_hh_t"], params["b_ih"], params["b_hh"])

    out_flat = outputs.reshape(T, H)
    hidden_out = out_flat[T - 1].reshape(1, 1, H)   # output == hidden for this module
    return out_flat, hidden_out


def encoder_rnn_forward(token_id, hidden, params, *, n_layers=1):
    """Exact analogue of EncoderRNN.forward(input, hidden) for one token."""
    H = params["embedding"].shape[1]
    tokens = jnp.asarray(token_id, jnp.int32).reshape(1)
    outs, hid = encoder_rnn_forward_seq(tokens, hidden, params, n_layers=n_layers)
    return outs.reshape(1, 1, H), hid


def _reference_seq(tokens, hidden, raw, *, n_layers=1):
    """Pure-JAX reference mirroring torch.nn.GRU equations (PyTorch layout)."""
    H = raw["embedding"].shape[1]
    h = hidden.reshape(1, H)
    outs = []
    for t in range(int(tokens.shape[0])):
        x = raw["embedding"][tokens[t]].reshape(1, H)
        for _ in range(n_layers):
            gi = x @ raw["w_ih"].T + raw["b_ih"]
            gh = h @ raw["w_hh"].T + raw["b_hh"]
            r = jax.nn.sigmoid(gi[:, 0:H] + gh[:, 0:H])
            z = jax.nn.sigmoid(gi[:, H:2 * H] + gh[:, H:2 * H])
            n = jnp.tanh(gi[:, 2 * H:] + r * gh[:, 2 * H:])
            h = (1.0 - z) * n + z * h
            x = h
        outs.append(x[0])
    return jnp.stack(outs), h.reshape(1, 1, H)


if __name__ == "__main__":
    input_size = 16        # vocab size
    hidden_size = 32
    n_layers = 1
    seq_len = 8

    key = jax.random.PRNGKey(0)
    pkey, tkey, hkey = jax.random.split(key, 3)

    raw = init_encoder_params(pkey, input_size, hidden_size)
    params = pack_encoder_params(raw)            # one-time repack (no per-call transpose)

    tokens = jax.random.randint(tkey, (seq_len,), 0, input_size, dtype=jnp.int32)
    # initHidden() -> zeros; use a random hidden to exercise the full cell.
    hidden0 = jax.random.normal(hkey, (1, 1, hidden_size), jnp.float32)

    # Whole sequence in a single pallas_call (weights resident in VMEM).
    seq_fn = jax.jit(functools.partial(encoder_rnn_forward_seq, n_layers=n_layers))
    outputs, hidden_T = seq_fn(tokens, hidden0, params)
    jax.block_until_ready((outputs, hidden_T))

    ref_out, ref_hid = _reference_seq(tokens, hidden0, raw, n_layers=n_layers)
    assert outputs.shape == (seq_len, hidden_size)
    assert hidden_T.shape == (1, 1, hidden_size)
    assert jnp.allclose(outputs, ref_out, atol=5e-5, rtol=5e-5)
    assert jnp.allclose(hidden_T, ref_hid, atol=5e-5, rtol=5e-5)

    # Single-token API, matching the PyTorch EncoderRNN.forward signature.
    out1, hid1 = encoder_rnn_forward(tokens[0], hidden0, params, n_layers=n_layers)
    jax.block_until_ready((out1, hid1))
    assert out1.shape == (1, 1, hidden_size) and hid1.shape == (1, 1, hidden_size)
    assert jnp.allclose(out1.reshape(-1), ref_out[0], atol=5e-5, rtol=5e-5)
    assert jnp.allclose(out1, hid1)

    print("KERNEL_OK")
</pallas_src>

<mosaic_0001>
module attributes {stable_mosaic.version = 11 : i64} {
  func.func @_encoder_gru_kernel(%arg0: i32, %arg1: memref<8xi32, #tpu.memory_space<smem>>, %arg2: memref<16x32xf32, #tpu.memory_space<vmem>>, %arg3: memref<1x32xf32, #tpu.memory_space<vmem>>, %arg4: memref<3x32x32xf32, #tpu.memory_space<vmem>>, %arg5: memref<3x32x32xf32, #tpu.memory_space<vmem>>, %arg6: memref<3x1x32xf32, #tpu.memory_space<vmem>>, %arg7: memref<3x1x32xf32, #tpu.memory_space<vmem>>, %arg8: memref<1x1x32xf32, #tpu.memory_space<vmem>>, %arg9: memref<1x32xf32, #tpu.memory_space<vmem>>) attributes {dimension_semantics = [#tpu.dimension_semantics<arbitrary>], iteration_bounds = array<i64: 8>, scalar_prefetch = 1 : i64, scratch_operands = 1 : i64, tpu.core_type = #tpu.core_type<tc>, window_params = [{pipeline_mode = #tpu.pipeline_mode<synchronous>, transform_indices = @transform_0, window_bounds = array<i64: 16, 32>}, {pipeline_mode = #tpu.pipeline_mode<synchronous>, transform_indices = @transform_1, window_bounds = array<i64: 1, 32>}, {pipeline_mode = #tpu.pipeline_mode<synchronous>, transform_indices = @transform_2, window_bounds = array<i64: 3, 32, 32>}, {pipeline_mode = #tpu.pipeline_mode<synchronous>, transform_indices = @transform_3, window_bounds = array<i64: 3, 32, 32>}, {pipeline_mode = #tpu.pipeline_mode<synchronous>, transform_indices = @transform_4, window_bounds = array<i64: 3, 1, 32>}, {pipeline_mode = #tpu.pipeline_mode<synchronous>, transform_indices = @transform_5, window_bounds = array<i64: 3, 1, 32>}, {transform_indices = @transform_6, window_bounds = array<i64: 1, 1, 32>}]} {
    %c0_i32 = arith.constant 0 : i32
    %0 = arith.cmpi eq, %arg0, %c0_i32 : i32
    %1 = arith.extui %0 : i1 to i32
    %c0_i32_0 = arith.constant 0 : i32
    %2 = arith.cmpi ne, %1, %c0_i32_0 : i32
    scf.if %2 {
      %c0_50 = arith.constant 0 : index
      %c0_51 = arith.constant 0 : index
      %68 = vector.load %arg3[%c0_50, %c0_51] : memref<1x32xf32, #tpu.memory_space<vmem>>, vector<1x32xf32>
      %c0_52 = arith.constant 0 : index
      %c0_53 = arith.constant 0 : index
      %69 = vector.load %arg9[%c0_52, %c0_53] : memref<1x32xf32, #tpu.memory_space<vmem>>, vector<1x32xf32>
      tpu.vector_store %arg9[%c0_52, %c0_53], %68 {strides = array<i32>} : memref<1x32xf32, #tpu.memory_space<vmem>>, vector<1x32xf32>,
    } else {
    }
    %3 = arith.index_cast %arg0 : i32 to index
    %4 = memref.load %arg1[%3] : memref<8xi32, #tpu.memory_space<smem>>
    %5 = arith.index_cast %4 : i32 to index
    %c0 = arith.constant 0 : index
    %6 = vector.load %arg2[%5, %c0] : memref<16x32xf32, #tpu.memory_space<vmem>>, vector<1x32xf32>
    %c0_1 = arith.constant 0 : index
    %c0_2 = arith.constant 0 : index
    %7 = vector.load %arg9[%c0_1, %c0_2] : memref<1x32xf32, #tpu.memory_space<vmem>>, vector<1x32xf32>
    %c0_3 = arith.constant 0 : index
    %c0_4 = arith.constant 0 : index
    %c0_5 = arith.constant 0 : index
    %8 = vector.load %arg4[%c0_3, %c0_4, %c0_5] : memref<3x32x32xf32, #tpu.memory_space<vmem>>, vector<1x32x32xf32>
    %9 = vector.shape_cast %8 : vector<1x32x32xf32> to vector<32x32xf32>
    %cst = arith.constant dense<0.000000e+00> : vector<1x32xf32>
    %10 = tpu.matmul %6, %9, %cst {dimension_numbers = #tpu.dot_dimension_numbers<[1], [0], [0], [1], [0, 0, 1, 1], [], []>} : vector<1x32xf32>, vector<32x32xf32>, vector<1x32xf32> -> vector<1x32xf32>
    %c0_6 = arith.constant 0 : index
    %c0_7 = arith.constant 0 : index
    %c0_8 = arith.constant 0 : index
    %11 = vector.load %arg6[%c0_6, %c0_7, %c0_8] : memref<3x1x32xf32, #tpu.memory_space<vmem>>, vector<1x1x32xf32>
    %12 = vector.shape_cast %11 : vector<1x1x32xf32> to vector<1x32xf32>
    %13 = arith.addf %10, %12 : vector<1x32xf32>
    %c1 = arith.constant 1 : index
    %c0_9 = arith.constant 0 : index
    %c0_10 = arith.constant 0 : index
    %14 = vector.load %arg4[%c1, %c0_9, %c0_10] : memref<3x32x32xf32, #tpu.memory_space<vmem>>, vector<1x32x32xf32>
    %15 = vector.shape_cast %14 : vector<1x32x32xf32> to vector<32x32xf32>
    %cst_11 = arith.constant dense<0.000000e+00> : vector<1x32xf32>
    %16 = tpu.matmul %6, %15, %cst_11 {dimension_numbers = #tpu.dot_dimension_numbers<[1], [0], [0], [1], [0, 0, 1, 1], [], []>} : vector<1x32xf32>, vector<32x32xf32>, vector<1x32xf32> -> vector<1x32xf32>
    %c1_12 = arith.constant 1 : index
    %c0_13 = arith.constant 0 : index
    %c0_14 = arith.constant 0 : index
    %17 = vector.load %arg6[%c1_12, %c0_13, %c0_14] : memref<3x1x32xf32, #tpu.memory_space<vmem>>, vector<1x1x32xf32>
    %18 = vector.shape_cast %17 : vector<1x1x32xf32> to vector<1x32xf32>
    %19 = arith.addf %16, %18 : vector<1x32xf32>
    %c2 = arith.constant 2 : index
    %c0_15 = arith.constant 0 : index
    %c0_16 = arith.constant 0 : index
    %20 = vector.load %arg4[%c2, %c0_15, %c0_16] : memref<3x32x32xf32, #tpu.memory_space<vmem>>, vector<1x32x32xf32>
    %21 = vector.shape_cast %20 : vector<1x32x32xf32> to vector<32x32xf32>
    %cst_17 = arith.constant dense<0.000000e+00> : vector<1x32xf32>
    %22 = tpu.matmul %6, %21, %cst_17 {dimension_numbers = #tpu.dot_dimension_numbers<[1], [0], [0], [1], [0, 0, 1, 1], [], []>} : vector<1x32xf32>, vector<32x32xf32>, vector<1x32xf32> -> vector<1x32xf32>
    %c2_18 = arith.constant 2 : index
    %c0_19 = arith.constant 0 : index
    %c0_20 = arith.constant 0 : index
    %23 = vector.load %arg6[%c2_18, %c0_19, %c0_20] : memref<3x1x32xf32, #tpu.memory_space<vmem>>, vector<1x1x32xf32>
    %24 = vector.shape_cast %23 : vector<1x1x32xf32> to vector<1x32xf32>
    %25 = arith.addf %22, %24 : vector<1x32xf32>
    %c0_21 = arith.constant 0 : index
    %c0_22 = arith.constant 0 : index
    %c0_23 = arith.constant 0 : index
    %26 = vector.load %arg5[%c0_21, %c0_22, %c0_23] : memref<3x32x32xf32, #tpu.memory_space<vmem>>, vector<1x32x32xf32>
    %27 = vector.shape_cast %26 : vector<1x32x32xf32> to vector<32x32xf32>
    %cst_24 = arith.constant dense<0.000000e+00> : vector<1x32xf32>
    %28 = tpu.matmul %7, %27, %cst_24 {dimension_numbers = #tpu.dot_dimension_numbers<[1], [0], [0], [1], [0, 0, 1, 1], [], []>} : vector<1x32xf32>, vector<32x32xf32>, vector<1x32xf32> -> vector<1x32xf32>
    %c0_25 = arith.constant 0 : index
    %c0_26 = arith.constant 0 : index
    %c0_27 = arith.constant 0 : index
    %29 = vector.load %arg7[%c0_25, %c0_26, %c0_27] : memref<3x1x32xf32, #tpu.memory_space<vmem>>, vector<1x1x32xf32>
    %30 = vector.shape_cast %29 : vector<1x1x32xf32> to vector<1x32xf32>
    %31 = arith.addf %28, %30 : vector<1x32xf32>
    %c1_28 = arith.constant 1 : index
    %c0_29 = arith.constant 0 : index
    %c0_30 = arith.constant 0 : index
    %32 = vector.load %arg5[%c1_28, %c0_29, %c0_30] : memref<3x32x32xf32, #tpu.memory_space<vmem>>, vector<1x32x32xf32>
    %33 = vector.shape_cast %32 : vector<1x32x32xf32> to vector<32x32xf32>
    %cst_31 = arith.constant dense<0.000000e+00> : vector<1x32xf32>
    %34 = tpu.matmul %7, %33, %cst_31 {dimension_numbers = #tpu.dot_dimension_numbers<[1], [0], [0], [1], [0, 0, 1, 1], [], []>} : vector<1x32xf32>, vector<32x32xf32>, vector<1x32xf32> -> vector<1x32xf32>
    %c1_32 = arith.constant 1 : index
    %c0_33 = arith.constant 0 : index
    %c0_34 = arith.constant 0 : index
    %35 = vector.load %arg7[%c1_32, %c0_33, %c0_34] : memref<3x1x32xf32, #tpu.memory_space<vmem>>, vector<1x1x32xf32>
    %36 = vector.shape_cast %35 : vector<1x1x32xf32> to vector<1x32xf32>
    %37 = arith.addf %34, %36 : vector<1x32xf32>
    %c2_35 = arith.constant 2 : index
    %c0_36 = arith.constant 0 : index
    %c0_37 = arith.constant 0 : index
    %38 = vector.load %arg5[%c2_35, %c0_36, %c0_37] : memref<3x32x32xf32, #tpu.memory_space<vmem>>, vector<1x32x32xf32>
    %39 = vector.shape_cast %38 : vector<1x32x32xf32> to vector<32x32xf32>
    %cst_38 = arith.constant dense<0.000000e+00> : vector<1x32xf32>
    %40 = tpu.matmul %7, %39, %cst_38 {dimension_numbers = #tpu.dot_dimension_numbers<[1], [0], [0], [1], [0, 0, 1, 1], [], []>} : vector<1x32xf32>, vector<32x32xf32>, vector<1x32xf32> -> vector<1x32xf32>
    %c2_39 = arith.constant 2 : index
    %c0_40 = arith.constant 0 : index
    %c0_41 = arith.constant 0 : index
    %41 = vector.load %arg7[%c2_39, %c0_40, %c0_41] : memref<3x1x32xf32, #tpu.memory_space<vmem>>, vector<1x1x32xf32>
    %42 = vector.shape_cast %41 : vector<1x1x32xf32> to vector<1x32xf32>
    %43 = arith.addf %40, %42 : vector<1x32xf32>
    %44 = arith.addf %13, %31 : vector<1x32xf32>
    %45 = arith.negf %44 : vector<1x32xf32>
    %46 = math.exp %45 : vector<1x32xf32>
    %cst_42 = arith.constant 1.000000e+00 : f32
    %47 = vector.broadcast %cst_42 : f32 to vector<1x32xf32>
    %48 = arith.addf %47, %46 : vector<1x32xf32>
    %49 = arith.divf %47, %48 : vector<1x32xf32>
    %50 = arith.addf %19, %37 : vector<1x32xf32>
    %51 = arith.negf %50 : vector<1x32xf32>
    %52 = math.exp %51 : vector<1x32xf32>
    %cst_43 = arith.constant 1.000000e+00 : f32
    %53 = vector.broadcast %cst_43 : f32 to vector<1x32xf32>
    %54 = arith.addf %53, %52 : vector<1x32xf32>
    %55 = arith.divf %53, %54 : vector<1x32xf32>
    %56 = arith.mulf %49, %43 : vector<1x32xf32>
    %57 = arith.addf %25, %56 : vector<1x32xf32>
    %58 = math.tanh %57 : vector<1x32xf32>
    %cst_44 = arith.constant 1.000000e+00 : f32
    %59 = vector.broadcast %cst_44 : f32 to vector<1x32xf32>
    %60 = arith.subf %59, %55 : vector<1x32xf32>
    %61 = arith.mulf %60, %58 : vector<1x32xf32>
    %62 = arith.mulf %55, %7 : vector<1x32xf32>
    %63 = arith.addf %61, %62 : vector<1x32xf32>
    %c0_45 = arith.constant 0 : index
    %c0_46 = arith.constant 0 : index
    %64 = vector.load %arg9[%c0_45, %c0_46] : memref<1x32xf32, #tpu.memory_space<vmem>>, vector<1x32xf32>
    tpu.vector_store %arg9[%c0_45, %c0_46], %63 {strides = array<i32>} : memref<1x32xf32, #tpu.memory_space<vmem>>, vector<1x32xf32>,
    %c0_47 = arith.constant 0 : index
    %c0_48 = arith.constant 0 : index
    %c0_49 = arith.constant 0 : index
    %65 = vector.load %arg8[%c0_47, %c0_48, %c0_49] : memref<1x1x32xf32, #tpu.memory_space<vmem>>, vector<1x1x32xf32>
    %66 = vector.shape_cast %65 : vector<1x1x32xf32> to vector<1x32xf32>
    %67 = vector.shape_cast %63 : vector<1x32xf32> to vector<1x1x32xf32>
    tpu.vector_store %arg8[%c0_47, %c0_48, %c0_49], %67 {strides = array<i32>} : memref<1x1x32xf32, #tpu.memory_space<vmem>>, vector<1x1x32xf32>,
    return
  }
  func.func @transform_0(%arg0: i32, %arg1: memref<8xi32, #tpu.memory_space<smem>>) -> (i32, i32) {
    %c0_i32 = arith.constant 0 : i32
    %c0_i32_0 = arith.constant 0 : i32
    %c0_i32_1 = arith.constant 0 : i32
    return %c0_i32, %c0_i32_0 : i32, i32
  }
  func.func @transform_1(%arg0: i32, %arg1: memref<8xi32, #tpu.memory_space<smem>>) -> (i32, i32) {
    %c0_i32 = arith.constant 0 : i32
    %c0_i32_0 = arith.constant 0 : i32
    %c0_i32_1 = arith.constant 0 : i32
    return %c0_i32, %c0_i32_0 : i32, i32
  }
  func.func @transform_2(%arg0: i32, %arg1: memref<8xi32, #tpu.memory_space<smem>>) -> (i32, i32, i32) {
    %c0_i32 = arith.constant 0 : i32
    %c0_i32_0 = arith.constant 0 : i32
    %c0_i32_1 = arith.constant 0 : i32
    %c0_i32_2 = arith.constant 0 : i32
    return %c0_i32, %c0_i32_0, %c0_i32_1 : i32, i32, i32
  }
  func.func @transform_3(%arg0: i32, %arg1: memref<8xi32, #tpu.memory_space<smem>>) -> (i32, i32, i32) {
    %c0_i32 = arith.constant 0 : i32
    %c0_i32_0 = arith.constant 0 : i32
    %c0_i32_1 = arith.constant 0 : i32
    %c0_i32_2 = arith.constant 0 : i32
    return %c0_i32, %c0_i32_0, %c0_i32_1 : i32, i32, i32
  }
  func.func @transform_4(%arg0: i32, %arg1: memref<8xi32, #tpu.memory_space<smem>>) -> (i32, i32, i32) {
    %c0_i32 = arith.constant 0 : i32
    %c0_i32_0 = arith.constant 0 : i32
    %c0_i32_1 = arith.constant 0 : i32
    %c0_i32_2 = arith.constant 0 : i32
    return %c0_i32, %c0_i32_0, %c0_i32_1 : i32, i32, i32
  }
  func.func @transform_5(%arg0: i32, %arg1: memref<8xi32, #tpu.memory_space<smem>>) -> (i32, i32, i32) {
    %c0_i32 = arith.constant 0 : i32
    %c0_i32_0 = arith.constant 0 : i32
    %c0_i32_1 = arith.constant 0 : i32
    %c0_i32_2 = arith.constant 0 : i32
    return %c0_i32, %c0_i32_0, %c0_i32_1 : i32, i32, i32
  }
  func.func @transform_6(%arg0: i32, %arg1: memref<8xi32, #tpu.memory_space<smem>>) -> (i32, i32, i32) {
    %c0_i32 = arith.constant 0 : i32
    %c0_i32_0 = arith.constant 0 : i32
    %c0_i32_1 = arith.constant 0 : i32
    return %arg0, %c0_i32, %c0_i32_0 : i32, i32, i32
  }
}

</mosaic_0001>

<bundles_post_ra>
// kernel: encoder_rnn_forward_seq.1
= control target key start
LH: loop header
LB: loop body
LE: loop exit
PB: predicated region body
PF: predicated region fallthrough
CT: control target
= control target key end

     0   :  { %s915_s27 = smov [#allocation4]   ;;  %s1071_s0 = inlined_call_operand.hbm [shape: s32[8], index: 0, kind: input, shape index: {}]   ;;  %s1072_s1 = inlined_call_operand.hbm [shape: f32[16,32], index: 1, kind: input, shape index: {}]   ;;  %s1073_s2 = inlined_call_operand.hbm [shape: f32[1,32], index: 2, kind: input, shape index: {}]   ;;  %s1074_s3 = inlined_call_operand.hbm [shape: f32[3,32,32], index: 3, kind: input, shape index: {}]   ;;  %s1075_s4 = inlined_call_operand.hbm [shape: f32[3,32,32], index: 4, kind: input, shape index: {}]   ;;  %s1076_s5 = inlined_call_operand.vmem [shape: f32[3,1,32], index: 5, kind: input, shape index: {}]   ;;  %s1077_s6 = inlined_call_operand.hbm [shape: f32[3,1,32], index: 6, kind: input, shape index: {}]   ;;  %s1078_s7 = inlined_call_operand.vmem [shape: f32[8,1,32], index: 7, kind: output, shape index: {}]  }
   0x1   :  { %s13_s26 = sshll.u32 %s1071_s0, 4  ;;  %s14_s26 = int_to_ptr.hbm [resolvable:$true] %s13_s26 }
   0x2   :  { %16 = dma.hbm_to_smem %s14_s26, 16, %s915_s27, [#allocation3] }
   0x3   :  { %897 = dma.done.wait [#allocation3], 16 }
   0x4   :  { %898 = vsyncadd [#allocation3], 4294967280 }
   0x5   :  { %19 = sfence }
   0x6   :  { %20 = vsyncpa [#allocation6], 0 }
   0x7   :  { %21 = vsyncpa [#allocation8], 0 }
   0x8   :  { %22 = vsyncpa [#allocation11], 0  ;;  %s968_s28 = smov 0  }
   0x9 LB: > { %s211_s0 = sshll.u32 %s1073_s2, 4  ;;  %s977_s8 = sadd.s32 4294967295, %s913_s28   ;;  %s913_s28 = sphi %s968_s28, %s28_s28   ;;  %s212_s0 = int_to_ptr.hbm [resolvable:$true] %s211_s0 }
   0xa   : > { %p632_p0 = scmp.ge.s32.totalorder %s913_s28, 1  ;;  %p185_p1 = scmp.lt.s32.totalorder %s913_s28, 9 }
   0xb   : > { %p633_p2 = scmp.ne.s32.totalorder %s977_s8, 0  ;;  %p693_p3 = scmp.eq.s32.totalorder %s977_s8, 0 }
   0xc   : > { %p983_p4 = pnand %p632_p0, %p185_p1  ;;  %s916_s10 = smov [#allocation7]  }
   0xd   : > { %s213_s11 = sshll.u32 %s916_s10, 4  ;;  %s236_s14 = sshll.u32 %s1075_s4, 4  ;;  %s214_s11 = int_to_ptr.vmem [resolvable:$true] %s213_s11  ;;  %s237_s14 = int_to_ptr.hbm [resolvable:$true] %s236_s14 }
   0xe   : > { %p677_p5 = pneg %p983_p4  ;;  %s917_s16 = smov [#allocation10]  }
   0xf   : > { %s238_s17 = sshll.u32 %s917_s16, 4  ;;  %s196_s20 = sshll.u32 %s1072_s1, 4  ;;  %s239_s17 = int_to_ptr.vmem [resolvable:$true] %s238_s17  ;;  %s197_s20 = int_to_ptr.hbm [resolvable:$true] %s196_s20 }
  0x10   : > { %p994_p6 = pnand %p693_p3, %p677_p5  ;;  %s918_s21 = smov 128  }
  0x11   : > { %s919_s22 = smov 8   ;;  %s920_s23 = smov [#allocation5]  }
  0x12   : > { %683 = dma.hbm_to_vmem [thread:$0]  (!%p994_p6), %s212_s0, 16, %s214_s11, [#allocation8]  }
  0x13   : > { %689 = dma.hbm_to_vmem [thread:$0]  (!%p994_p6), %s237_s14, 1536, %s239_s17, [#allocation11], %s918_s21, %s918_s21, %s919_s22  }
  0x14   : > { %s198_s24 = sshll.u32 %s920_s23, 4  ;;  %s222_s27 = sshll.u32 %s1074_s3, 4  ;;  %s199_s24 = int_to_ptr.vmem [resolvable:$true] %s198_s24  ;;  %s223_s27 = int_to_ptr.hbm [resolvable:$true] %s222_s27 }
  0x15   : > { %680 = dma.hbm_to_vmem [thread:$0]  (!%p994_p6), %s197_s20, 256, %s199_s24, [#allocation6], %s918_s21, %s918_s21, %s919_s22  }
  0x16   : > { %s253_s0 = sshll.u32 %s1077_s6, 4  ;;  %s921_s10 = smov [#allocation9]   ;;  %s254_s0 = int_to_ptr.hbm [resolvable:$true] %s253_s0 }
  0x17   : > { %s224_s11 = sshll.u32 %s921_s10, 4  ;;  %s922_s12 = smov [#allocation12]   ;;  %s225_s11 = int_to_ptr.vmem [resolvable:$true] %s224_s11 }
  0x18   : > { %686 = dma.hbm_to_vmem [thread:$0]  (!%p994_p6), %s223_s27, 1536, %s225_s11, [#allocation8], %s918_s21, %s918_s21, %s919_s22  }
  0x19   : > { %s255_s13 = sshll.u32 %s922_s12, 4  ;;  %s923_s14 = smov 16   ;;  %s256_s13 = int_to_ptr.vmem [resolvable:$true] %s255_s13 }
  0x1a   : > { %s924_s16 = smov 1   ;;  %271 = sbr.rel (%p983_p4) target bundleno = 233 (0xe9), region = 44 }
  0x1b   : > { %692 = dma.hbm_to_vmem [thread:$0]  (!%p994_p6), %s254_s0, 48, %s256_s13, [#allocation11], %s923_s14, %s923_s14, %s924_s16  }
  0x1f   : > { %900 = dma.done.wait (%p693_p3), [#allocation6], 256  }
  0x20   : > { %902 = vsyncadd (%p693_p3), [#allocation6], 4294967040 }
  0x21   : > { %904 = dma.done.wait (%p693_p3), [#allocation8], 1552  }
  0x22   : > { %906 = vsyncadd (%p693_p3), [#allocation8], 4294965744 }
  0x23   : > { %908 = dma.done.wait (%p693_p3), [#allocation11], 1584  }
  0x24   : > { %910 = vsyncadd (%p693_p3), [#allocation11], 4294965712  ;;  %p315_p7 = scmp.lt.s32.totalorder %s977_s8, 7  ;;  %321 = sbr.rel (%p633_p2) target bundleno = 43 (0x2b), region = 68 }
  0x26   : > { %s1033_s9 = scalar_select %p315_p7, %s977_s8, 7 }
  0x28   : > { %s317_s18 = scalar_lea.vmem %s1078_s7, %s1033_s9 }
  0x29   : > { %v322_v0 = vld [vmem:[#allocation7] sm:$0x1]  ;;  %vm323_vm0 = vcmask 253952  }
  0x2a   : > { %324 = vst.msk [vmem:[#allocation2] sm:$0x1] %vm323_vm0, %v322_v0 }
  0x2b PF: > { %v332_v1 = vld [vmem:[#allocation9 + $0x18] sm:$0xff]  ;;  %v331_v3 = vld [vmem:[#allocation9 + $0x10] sm:$0xff]  ;;  %s325_s19 = sld [smem:[#allocation4 + %s977_s8]]  ;;  %v330_v5 = vld [vmem:[#allocation9 + $0x8] sm:$0xff]  ;;  %vm334_vm1 = vcmask 261120   ;;  %vm541_vm10 = vcmask 253952  }
  0x2c   : > { %v415_v2 = vld [vmem:[#allocation10 + $0x18] sm:$0xff]  ;;  %350 = vmatpush.msra.mxu0 %v332_v1  ;;  %v414_v4 = vld [vmem:[#allocation10 + $0x10] sm:$0xff]  ;;  %v413_v6 = vld [vmem:[#allocation10 + $0x8] sm:$0xff] }
  0x2d   : > { %432 = vmatpush.msra.mxu3 %v415_v2  ;;  %v362_v7 = vld [vmem:[#allocation9 + $0x38] sm:$0xff]  ;;  %v361_v8 = vld [vmem:[#allocation9 + $0x30] sm:$0xff]  ;;  %v329_v9 = vld [vmem:[#allocation9] sm:$0xff] }
  0x2e   : > { %351 = vmatpush.msra.mxu0 %v331_v3  ;;  %v412_v10 = vld [vmem:[#allocation10] sm:$0xff]  ;;  %377 = vmatpush.msra.mxu1 %v362_v7  ;;  %v389_v12 = vld [vmem:[#allocation9 + $0x58] sm:$0xff]  ;;  %v360_v14 = vld [vmem:[#allocation9 + $0x28] sm:$0xff] }
  0x2f   : > { %433 = vmatpush.msra.mxu3 %v414_v4  ;;  %v444_v13 = vld [vmem:[#allocation10 + $0x38] sm:$0xff]  ;;  %404 = vmatpush.msra.mxu2 %v389_v12  ;;  %v388_v16 = vld [vmem:[#allocation9 + $0x50] sm:$0xff]  ;;  %v359_v18 = vld [vmem:[#allocation9 + $0x20] sm:$0xff] }
  0x30   : > { %352 = vmatpush.msra.mxu0 %v330_v5  ;;  %378 = vmatpush.msra.mxu1 %v361_v8  ;;  %v443_v17 = vld [vmem:[#allocation10 + $0x30] sm:$0xff]  ;;  %v387_v19 = vld [vmem:[#allocation9 + $0x48] sm:$0xff]  ;;  %v471_v21 = vld [vmem:[#allocation10 + $0x58] sm:$0xff] }
  0x31   : > { %434 = vmatpush.msra.mxu3 %v413_v6  ;;  %v1042_v11 = vld [vmem:[#allocation2] sm:$0x1]  ;;  %s326_s8 = scalar_lea.vmem [#allocation5], %s325_s19  ;;  %405 = vmatpush.msra.mxu2 %v388_v16  ;;  %v386_v22 = vld [vmem:[#allocation9 + $0x40] sm:$0xff]  ;;  %v470_v24 = vld [vmem:[#allocation10 + $0x50] sm:$0xff] }
  0x32   : > { %353 = vmatpush.msra.mxu0 %v329_v9  ;;  %v327_v15 = vld [vmem:[%s326_s8] sm:$0x1]  ;;  %379 = vmatpush.msra.mxu1 %v360_v14  ;;  %v441_v23 = vld [vmem:[#allocation10 + $0x20] sm:$0xff]  ;;  %v646_v30 = vld [vmem:[%s1076_s5 + $0x1] sm:$0x1] }
  0x33   : > { %435 = vmatpush.msra.mxu3 %v412_v10  ;;  %645 = vmatmul.msk.f32.vlgmr.msra.gmra.mxu0 %vm334_vm1, %v327_v15  ;;  %v442_v20 = vld [vmem:[#allocation10 + $0x28] sm:$0xff]  ;;  %v468_v26 = vld [vmem:[#allocation10 + $0x40] sm:$0xff] }
  0x34   : > { %650 = vmatmul.msk.f32.vlgmr.msra.gmra.mxu3 %vm334_vm1, %v1042_v11  ;;  %459 = vmatpush.msrb.mxu0 %v444_v13  ;;  %v469_v25 = vld [vmem:[#allocation10 + $0x48] sm:$0xff]  ;;  %v416_v29 = vld [vmem:[#allocation12] sm:$0x1]  ;;  %v446_v34 = vld [vmem:[#allocation12 + $0x1] sm:$0x1] }
  0x35   : > { %380 = vmatpush.msra.mxu1 %v359_v18  ;;  %406 = vmatpush.msra.mxu2 %v387_v19  ;;  %v333_v28 = vld [vmem:[%s1076_s5] sm:$0x1]  ;;  %v473_v52 = vld [vmem:[#allocation12 + $0x2] sm:$0x1]  ;;  %v648_v58 = vld [vmem:[%s1076_s5 + $0x2] sm:$0x1] }
  0x36   : > { %460 = vmatpush.msrb.mxu0 %v443_v17  ;;  %647 = vmatmul.msk.f32.vlgmr.msra.gmra.mxu1 %vm334_vm1, %v327_v15 }
  0x37   : > { %486 = vmatpush.msrb.mxu1 %v471_v21  ;;  %407 = vmatpush.msra.mxu2 %v386_v22 }
  0x38   : > { %461 = vmatpush.msrb.mxu0 %v442_v20  ;;  %649 = vmatmul.msk.f32.vlgmr.msra.gmra.mxu2 %vm334_vm1, %v327_v15 }
  0x39   : > { %487 = vmatpush.msrb.mxu1 %v470_v24 }
  0x3a   : > { %462 = vmatpush.msrb.mxu0 %v441_v23 }
  0x3b   : > { %651 = vmatmul.msk.f32.vlgmr.msrb.gmra.mxu0 %vm334_vm1, %v1042_v11  ;;  %488 = vmatpush.msrb.mxu1 %v469_v25 }
  0x3d   : > { %489 = vmatpush.msrb.mxu1 %v468_v26 }
  0x3e   : > { %652 = vmatmul.msk.f32.vlgmr.msrb.gmra.mxu1 %vm334_vm1, %v1042_v11 }
  0xb0   : > { %v355_v27 = vpop.f32.mrf.mxu0 }
  0xb1   : > { %v356_v32 = vadd.f32 %v355_v27, %v333_v28 }
  0xb3   : > { %v382_v31 = vpop.f32.mrf.mxu1 }
  0xb4   : > { %v383_v36 = vadd.f32 %v646_v30, %v382_v31 }
  0xb7   : > { %v437_v33 = vpop.f32.mrf.mxu3 }
  0xb8   : > { %v438_v35 = vadd.f32 %v437_v33, %v416_v29  ;;  %v464_v37 = vpop.f32.mrf.mxu0 }
  0xb9   : > { %v465_v39 = vadd.f32 %v464_v37, %v446_v34 }
  0xba   : > { %v494_v38 = vadd.f32 %v438_v35, %v356_v32 }
  0xbb   : > { %v514_v41 = vadd.f32 %v465_v39, %v383_v36  ;;  %v491_v53 = vpop.f32.mrf.mxu1  ;;  %v409_v59 = vpop.f32.mrf.mxu2 }
  0xbc   : > { %v653_v40 = vmul.f32 -1.442695, %v494_v38  ;;  %v492_v61 = vadd.f32 %v491_v53, %v473_v52  ;;  %v410_v1 = vadd.f32 %v648_v58, %v409_v59 }
  0xbd   : > { %v654_v42 = vmul.f32 -1.442695, %v514_v41 }
  0xbe   : > { %721 = vpow2.f32 %v653_v40 }
  0xbf   : > { %723 = vpow2.f32 %v654_v42 }
  0xc4   : > { %v722_v43 = vpop.eup %721 }
  0xc5   : > { %v498_v44 = vadd.f32 1.0, %v722_v43  ;;  %v724_v45 = vpop.eup %723 }
  0xc6   : > { %v518_v46 = vadd.f32 1.0, %v724_v45 }
  0xc7   : > { %725 = vrcp.f32 %v498_v44  ;;  %v510_v54 = vand.u32 2147483648, %v498_v44  ;;  %v508_v57 = vand.u32 2147483647, %v498_v44  ;;  %vm504_vm3 = vweird.f32 %v498_v44 }
  0xc8   : > { %727 = vrcp.f32 %v518_v46  ;;  %vm524_vm6 = vweird.f32 %v518_v46  ;;  %v530_v4 = vand.u32 2147483648, %v518_v46  ;;  %v528_v6 = vand.u32 2147483647, %v518_v46 }
  0xc9   : > { %v511_v63 = vor.u32 1.1754944e-38, %v510_v54  ;;  %vm509_vm5 = vcmp.eq.f32.partialorder %v508_v57, 8.507059e+37 }
  0xca   : > { %v531_v9 = vor.u32 1.1754944e-38, %v530_v4  ;;  %vm529_vm9 = vcmp.eq.f32.partialorder %v528_v6, 8.507059e+37 }
  0xcd   : > { %v726_v47 = vpop.eup %725 }
  0xce   : > { %v500_v48 = vmul.f32 %v726_v47, %v498_v44  ;;  %v728_v49 = vpop.eup %727  ;;  %vm505_vm2 = vweird.f32 %v726_v47 }
  0xcf   : > { %v520_v50 = vmul.f32 %v728_v49, %v518_v46  ;;  %vm506_vm4 = vmor %vm504_vm3, %vm505_vm2  ;;  %vm525_vm7 = vweird.f32 %v728_v49 }
  0xd0   : > { %v501_v51 = vsub.f32 1.0, %v500_v48  ;;  %vm526_vm8 = vmor %vm524_vm6, %vm525_vm7 }
  0xd1   : > { %v521_v55 = vsub.f32 1.0, %v520_v50 }
  0xd2   : > { %v502_v56 = vmul.f32 %v726_v47, %v501_v51 }
  0xd3   : > { %v522_v60 = vmul.f32 %v728_v49, %v521_v55 }
  0xd4   : > { %v503_v62 = vadd.f32 %v726_v47, %v502_v56 }
  0xd5   : > { %v523_v3 = vadd.f32 %v728_v49, %v522_v60 }
  0xd6   : > { %v507_v0 = vsel %vm506_vm4, %v726_v47, %v503_v62 }
  0xd7   : > { %v512_v2 = vsel %vm509_vm5, %v511_v63, %v507_v0  ;;  %v527_v8 = vsel %vm526_vm8, %v728_v49, %v523_v3 }
  0xd8   : > { %v534_v5 = vmul.f32 %v512_v2, %v492_v61  ;;  %v532_v10 = vsel %vm529_vm9, %v531_v9, %v527_v8 }
  0xd9   : > { %v537_v12 = vsub.f32 1.0, %v532_v10  ;;  %v539_v15 = vmul.f32 %v532_v10, %v1042_v11 }
  0xda   : > { %v535_v7 = vadd.f32 %v534_v5, %v410_v1 }
  0xdc   : > { %729 = vtanh.f32 %v535_v7 }
  0xe2   : > { %v730_v13 = vpop.eup %729 }
  0xe3   : > { %v538_v14 = vmul.f32 %v730_v13, %v537_v12 }
  0xe5   : > { %v540_v16 = vadd.f32 %v539_v15, %v538_v14 }
  0xe7   : > { %542 = vst.msk [vmem:[#allocation2] sm:$0x1] %vm541_vm10, %v540_v16 }
  0xe8   : > { %543 = vst.msk [vmem:[%s317_s18] sm:$0x1] %vm541_vm10, %v540_v16 }
  0xe9 PF: > { %s28_s28 = sadd.s32 1, %s913_s28  }
  0xea   : > { %p25_p8 = scmp.ge.s32.totalorder %s28_s28, 10  }
  0xec   :  { %27 = sbr.rel (!%p25_p8) target bundleno = 9 (0x9), region = 105 }
  0xf1   :  { %561 = vsyncpa [#allocation6], 1 }
  0xf2   :  { %563 = vsyncpa [#allocation6 + $0x1], 1 }
  0xf3   :  { %564 = vsyncpa [#allocation8], 1 }
  0xf4   :  { %565 = vsyncpa [#allocation11], 1 }

</bundles_post_ra>
